<compile_context>
chip_gen: v5e
topology: v5e:2x2
jax: 0.10.0
libtpu: 0.0.40
codegen_flags: <defaults>
</compile_context>

<pallas_src>
import numpy as np
import jax
import jax.numpy as jnp
from jax.experimental import pallas as pl
from jax.experimental.pallas import tpu as pltpu

POOL_SIZES = (1, 2, 3, 6)
KK_PAD = 128          # 1 + 4 + 9 + 36 = 50 pooled pixels, padded to lane width
NEG_MASK = -1e30      # "minus infinity" for the ReLU-based cross-branch mask


def _adaptive_pool_matrix(in_size: int, out_size: int) -> np.ndarray:
    """P[i, h]: pooled[i] = sum_h P[i, h] * x[h] (PyTorch AdaptiveAvgPool1d rule)."""
    P = np.zeros((out_size, in_size), dtype=np.float32)
    for i in range(out_size):
        start = (i * in_size) // out_size
        end = -(-((i + 1) * in_size) // out_size)  # ceil
        P[i, start:end] = 1.0 / (end - start)
    return P


def _bilinear_up_matrix(out_size: int, in_size: int) -> np.ndarray:
    """U[h, i]: bilinear interpolation (align_corners=True) from in_size -> out_size."""
    U = np.zeros((out_size, in_size), dtype=np.float32)
    if in_size == 1:
        U[:, 0] = 1.0
        return U
    for h in range(out_size):
        src = h * (in_size - 1) / (out_size - 1) if out_size > 1 else 0.0
        lo = int(np.floor(src))
        hi = min(lo + 1, in_size - 1)
        frac = src - lo
        U[h, lo] += 1.0 - frac
        U[h, hi] += frac
    return U


def _psp_kernel(x_ref, at_ref, up_ref, w_ref, bias_ref, out_ref,
                pooled_ref, y_ref):
    # Grid: (batch n [parallel], phase p [0=pool(+conv), 1=upsample], hw tile t)
    # x_ref    : (C, HW_TILE)     f32   input tile (phase 0; cast to bf16 in-kernel)
    # at_ref   : (hw_pad, 128)    bf16  merged adaptive-avg-pool operator (VMEM-resident)
    # up_ref   : (128, hw_pad)    bf16  merged bilinear upsample operator (VMEM-resident)
    # w_ref    : (4*Co, C)        bf16  stacked 1x1 conv weights (BN scale folded in)
    # bias_ref : (4*Co, 128)      f32   BN shift on own-branch KK columns, -1e30 elsewhere
    # out_ref  : (4*Co, HW_TILE)  bf16  pyramid feature tile
    # pooled_ref scratch (C, 128) f32 ; y_ref scratch (4*Co, 128) bf16
    p = pl.program_id(1)
    t = pl.program_id(2)
    hw_tile = out_ref.shape[-1]
    start = pl.multiple_of(t * hw_tile, hw_tile)   # lane-aligned window into at/up

    @pl.when((p == 0) & (t == 0))
    def _init():
        pooled_ref[...] = jnp.zeros_like(pooled_ref)

    @pl.when(p == 0)
    def _pool():
        # Accumulate the HW contraction of the merged pooling operator.
        # x arrives as f32; the bf16 cast is a (free) VPU op under the DMA.
        pooled_ref[...] += jnp.dot(
            x_ref[...].astype(jnp.bfloat16),
            at_ref[pl.ds(start, hw_tile), :],
            preferred_element_type=jnp.float32)

    @pl.when((p == 0) & (t == pl.num_programs(2) - 1))
    def _conv_bn_relu():
        # Stacked 1x1 conv for all 4 branches in one matmul (BN scale folded
        # into w).  Runs right after the final pooled accumulation so it is
        # hidden under the phase-transition DMA prologue.  bias holds the BN
        # shift on a row's own-branch KK columns and -1e30 everywhere else, so
        # the ReLU zeroes every cross-branch / KK-padding contribution before
        # the upsample matmul (the zero rows of `up` are a second defence).
        yv = jnp.dot(w_ref[...], pooled_ref[...].astype(jnp.bfloat16),
                     preferred_element_type=jnp.float32)
        y_ref[...] = jnp.maximum(yv + bias_ref[...], 0.0).astype(y_ref.dtype)

    @pl.when(p == 1)
    def _upsample():
        out_ref[...] = jnp.dot(
            y_ref[...], up_ref[:, pl.ds(start, hw_tile)],
            preferred_element_type=jnp.float32).astype(out_ref.dtype)


def pyramid_pooling(x, conv_weights, bn_scales, bn_shifts):
    """x: (N, C, H, W) f32.  conv_weights: 4 x (C//4, C).  bn_*: 4 x (C//4,)."""
    N, C, H, W = x.shape
    Co = C // 4
    C4 = 4 * Co
    HW = H * W

    # Lane-dense spatial tiling: HW rounded up to a multiple of the tile width.
    HW_TILE = min(1024, -(-HW // 128) * 128)      # <= 1024, multiple of 128
    hw_pad = -(-HW // HW_TILE) * HW_TILE
    T = hw_pad // HW_TILE

    kk_sizes = [k * k for k in POOL_SIZES]
    kk_off = np.concatenate([[0], np.cumsum(kk_sizes)])     # [0, 1, 5, 14, 50]
    assert kk_off[-1] <= KK_PAD

    # Merged pooling / upsample operators, zero in the HW padding and in the
    # KK rows/columns >= 50.
    at_np = np.zeros((hw_pad, KK_PAD), np.float32)
    up_np = np.zeros((KK_PAD, hw_pad), np.float32)
    for b, k in enumerate(POOL_SIZES):
        Ph = _adaptive_pool_matrix(H, k)
        Pw = _adaptive_pool_matrix(W, k)
        at_np[:HW, kk_off[b]:kk_off[b + 1]] = np.kron(Ph, Pw).T     # (HW, k*k)
        Uh = _bilinear_up_matrix(H, k)
        Uw = _bilinear_up_matrix(W, k)
        up_np[kk_off[b]:kk_off[b + 1], :HW] = np.kron(Uh, Uw).T     # (k*k, HW)

    # Fold BN(eval) scale into the 1x1 conv weights; stack the 4 branches.
    w_all = jnp.concatenate(
        [bn_scales[b][:, None] * conv_weights[b] for b in range(4)], axis=0
    ).astype(jnp.bfloat16)                                          # (4*Co, C)

    # BN shift + cross-branch / padding mask folded into one bias array.
    bias = jnp.full((C4, KK_PAD), NEG_MASK, jnp.float32)
    for b in range(4):
        bias = bias.at[b * Co:(b + 1) * Co, kk_off[b]:kk_off[b + 1]].set(
            bn_shifts[b][:, None])

    # x stays f32: the bf16 cast happens inside the kernel (VPU, under the
    # tile DMA) instead of as a separate full read+write pass over HBM.
    x_flat = x.reshape(N, C, HW)
    if hw_pad != HW:
        # TODO(synk): when HW is not a multiple of HW_TILE this pad is still
        # one extra pass over x; a ragged last tile would remove it.
        x_flat = jnp.pad(x_flat, ((0, 0), (0, 0), (0, hw_pad - HW)))
    at_op = jnp.asarray(at_np, jnp.bfloat16)
    up_op = jnp.asarray(up_np, jnp.bfloat16)

    def _build(single_buffer_consts):
        # Constant-index operands are DMA'd once for the whole call; with
        # Buffered(1) their dead second pipeline buffer is also reclaimed.
        const_kw = ({"pipeline_mode": pl.Buffered(1)}
                    if single_buffer_consts else {})
        nbuf = 1 if single_buffer_consts else 2

        in_specs = [
            # x streams one tile per phase-0 step and stays parked on the last
            # tile during phase 1 (block index unchanged => no re-fetch).
            pl.BlockSpec((None, C, HW_TILE),
                         lambda n, p, t: (n, 0, t * (1 - p) + (T - 1) * p)),
            pl.BlockSpec((hw_pad, KK_PAD), lambda n, p, t: (0, 0), **const_kw),
            pl.BlockSpec((KK_PAD, hw_pad), lambda n, p, t: (0, 0), **const_kw),
            pl.BlockSpec((C4, C), lambda n, p, t: (0, 0), **const_kw),
            pl.BlockSpec((C4, KK_PAD), lambda n, p, t: (0, 0), **const_kw),
        ]
        out_specs = pl.BlockSpec((None, C4, HW_TILE),
                                 lambda n, p, t: (n, 0, t * p))

        # Size the scoped-VMEM limit from the actual need (+16 MiB margin for
        # Mosaic internal scratch) rather than hard-coding 64 MiB, which is
        # the entire per-TensorCore VMEM on v7x.
        vmem_need = (
            2 * C * HW_TILE * 4                      # x tiles, f32, dbl-buffered
            + 2 * C4 * HW_TILE * 2                   # out tiles, bf16, dbl-buffered
            + nbuf * 2 * hw_pad * KK_PAD * 2         # at + up operators, bf16
            + nbuf * C4 * C * 2                      # stacked conv weights, bf16
            + nbuf * C4 * KK_PAD * 4                 # bias / mask, f32
            + C * KK_PAD * 4 + C4 * KK_PAD * 2       # scratch (pooled, y)
        )
        return pl.pallas_call(
            _psp_kernel,
            out_shape=jax.ShapeDtypeStruct((N, C4, hw_pad), jnp.bfloat16),
            grid_spec=pltpu.PrefetchScalarGridSpec(
                num_scalar_prefetch=0,
                grid=(N, 2, T),
                in_specs=in_specs,
                out_specs=out_specs,
                scratch_shapes=[
                    pltpu.VMEM((C, KK_PAD), jnp.float32),     # pooled accumulator
                    pltpu.VMEM((C4, KK_PAD), jnp.bfloat16),   # post-BN/ReLU branch maps
                ],
            ),
            compiler_params=pltpu.CompilerParams(
                # TODO(synk): batch is the only parallel axis; on v7x (2 TCs)
                # one core idles when N == 1 / N is odd — a parallel axis over
                # C4 output-channel blocks in phase 1 would fix that.
                dimension_semantics=("parallel", "arbitrary", "arbitrary"),
                vmem_limit_bytes=int(vmem_need) + (16 << 20),
            ),
        )

    try:
        feats_flat = _build(True)(x_flat, at_op, up_op, w_all, bias)
    except Exception:
        # Fallback for jax versions without single-buffered (Buffered(1))
        # operand support; only costs the dead second buffer of at/up/w/bias.
        feats_flat = _build(False)(x_flat, at_op, up_op, w_all, bias)

    feats = feats_flat[:, :, :HW].reshape(N, C4, H, W).astype(x.dtype)
    # Identity branch of the concat stays outside the kernel (pure copy).
    # TODO(synk): when HW % 128 == 0 the kernel could write directly at channel
    # offset C of a preallocated (N, 2C, HW) buffer to skip this concat pass.
    return jnp.concatenate([x, feats], axis=1)


def reference(x, conv_weights, bn_scales, bn_shifts):
    """Plain-JAX f32 reference (NCHW, einsum-based) for correctness checking."""
    N, C, H, W = x.shape
    feats = [x]
    for b, k in enumerate(POOL_SIZES):
        Ph = jnp.asarray(_adaptive_pool_matrix(H, k))
        Pw = jnp.asarray(_adaptive_pool_matrix(W, k))
        pooled = jnp.einsum('nchw,ih,jw->ncij', x, Ph, Pw)
        y = jnp.einsum('oc,ncij->noij', conv_weights[b], pooled)
        y = y * bn_scales[b][None, :, None, None] + bn_shifts[b][None, :, None, None]
        y = jnp.maximum(y, 0.0)
        Uh = jnp.asarray(_bilinear_up_matrix(H, k))
        Uw = jnp.asarray(_bilinear_up_matrix(W, k))
        feats.append(jnp.einsum('noij,hi,wj->nohw', y, Uh, Uw))
    return jnp.concatenate(feats, axis=1)


if __name__ == "__main__":
    N, C, H, W = 2, 8, 16, 16
    Co = C // 4

    key = jax.random.PRNGKey(0)
    k_x, kw0, kw1, kw2, kw3 = jax.random.split(key, 5)
    x = jax.random.normal(k_x, (N, C, H, W), jnp.float32)
    conv_weights = [0.1 * jax.random.normal(kw, (Co, C), jnp.float32)
                    for kw in (kw0, kw1, kw2, kw3)]

    # BatchNorm2d folded to per-channel scale/shift (eval mode, deterministic params).
    # TODO(synk): training-mode BatchNorm (batch statistics) is not reproduced;
    # norm_layer is applied in eval mode with deterministic running stats.
    eps = 1e-5
    bn_scales, bn_shifts = [], []
    for b in range(4):
        gamma = 1.0 + 0.1 * jnp.arange(Co, dtype=jnp.float32)
        beta = 0.05 * (b + 1) * (1.0 + jnp.arange(Co, dtype=jnp.float32))
        running_mean = 0.01 * b * jnp.ones((Co,), jnp.float32)
        running_var = 1.0 + 0.2 * jnp.arange(Co, dtype=jnp.float32)
        scale = gamma / jnp.sqrt(running_var + eps)
        shift = beta - running_mean * scale
        bn_scales.append(scale)
        bn_shifts.append(shift)

    out = pyramid_pooling(x, conv_weights, bn_scales, bn_shifts)
    out = jax.block_until_ready(out)

    ref = reference(x, conv_weights, bn_scales, bn_shifts)
    assert out.shape == (N, 2 * C, H, W), out.shape
    # Tolerance reflects bf16 matmul operands + bf16 feature output
    # (f32 accumulation on the MXU).
    np.testing.assert_allclose(np.asarray(out), np.asarray(ref), rtol=2e-2, atol=2e-2)
    print("KERNEL_OK")
</pallas_src>

<mosaic_0001>
module attributes {stable_mosaic.version = 11 : i64} {
  func.func @_psp_kernel(%arg0: i32, %arg1: i32, %arg2: i32, %arg3: memref<1x8x256xf32, #tpu.memory_space<vmem>>, %arg4: memref<256x128xbf16, #tpu.memory_space<vmem>>, %arg5: memref<128x256xbf16, #tpu.memory_space<vmem>>, %arg6: memref<8x8xbf16, #tpu.memory_space<vmem>>, %arg7: memref<8x128xf32, #tpu.memory_space<vmem>>, %arg8: memref<1x8x256xbf16, #tpu.memory_space<vmem>>, %arg9: memref<8x128xf32, #tpu.memory_space<vmem>>, %arg10: memref<8x128xbf16, #tpu.memory_space<vmem>>) attributes {dimension_semantics = [#tpu.dimension_semantics<parallel>, #tpu.dimension_semantics<arbitrary>, #tpu.dimension_semantics<arbitrary>], iteration_bounds = array<i64: 2, 2, 1>, scalar_prefetch = 0 : i64, scratch_operands = 2 : i64, tpu.core_type = #tpu.core_type<tc>, window_params = [{transform_indices = @transform_0, window_bounds = array<i64: 1, 8, 256>}, {pipeline_mode = #tpu.pipeline_mode<synchronous>, transform_indices = @transform_1, window_bounds = array<i64: 256, 128>}, {pipeline_mode = #tpu.pipeline_mode<synchronous>, transform_indices = @transform_2, window_bounds = array<i64: 128, 256>}, {pipeline_mode = #tpu.pipeline_mode<synchronous>, transform_indices = @transform_3, window_bounds = array<i64: 8, 8>}, {pipeline_mode = #tpu.pipeline_mode<synchronous>, transform_indices = @transform_4, window_bounds = array<i64: 8, 128>}, {transform_indices = @transform_5, window_bounds = array<i64: 1, 8, 256>}]} {
    %c256_i32 = arith.constant 256 : i32
    %0 = arith.muli %arg2, %c256_i32 : i32
    %1 = tpu.assume_multiple %0, 256 : i32
    %c0_i32 = arith.constant 0 : i32
    %2 = arith.cmpi eq, %arg1, %c0_i32 : i32
    %c0_i32_0 = arith.constant 0 : i32
    %3 = arith.cmpi eq, %arg2, %c0_i32_0 : i32
    %4 = arith.andi %2, %3 : i1
    %5 = arith.extui %4 : i1 to i32
    %c0_i32_1 = arith.constant 0 : i32
    %6 = arith.cmpi ne, %5, %c0_i32_1 : i32
    scf.if %6 {
      %cst = arith.constant 0.000000e+00 : f32
      %18 = vector.broadcast %cst : f32 to vector<8x128xf32>
      %c0 = arith.constant 0 : index
      %c0_8 = arith.constant 0 : index
      %19 = vector.load %arg9[%c0, %c0_8] : memref<8x128xf32, #tpu.memory_space<vmem>>, vector<8x128xf32>
      tpu.vector_store %arg9[%c0, %c0_8], %18 {strides = array<i32>} : memref<8x128xf32, #tpu.memory_space<vmem>>, vector<8x128xf32>,
    } else {
    }
    %c0_i32_2 = arith.constant 0 : i32
    %7 = arith.cmpi eq, %arg1, %c0_i32_2 : i32
    %8 = arith.extui %7 : i1 to i32
    %c0_i32_3 = arith.constant 0 : i32
    %9 = arith.cmpi ne, %8, %c0_i32_3 : i32
    scf.if %9 {
      %c0 = arith.constant 0 : index
      %c0_8 = arith.constant 0 : index
      %18 = vector.load %arg9[%c0, %c0_8] : memref<8x128xf32, #tpu.memory_space<vmem>>, vector<8x128xf32>
      %c0_9 = arith.constant 0 : index
      %c0_10 = arith.constant 0 : index
      %c0_11 = arith.constant 0 : index
      %19 = vector.load %arg3[%c0_9, %c0_10, %c0_11] : memref<1x8x256xf32, #tpu.memory_space<vmem>>, vector<1x8x256xf32>
      %20 = vector.shape_cast %19 : vector<1x8x256xf32> to vector<8x256xf32>
      %21 = arith.truncf %20 : vector<8x256xf32> to vector<8x256xbf16>
      %22 = arith.index_cast %1 : i32 to index
      %c0_12 = arith.constant 0 : index
      %23 = vector.load %arg4[%22, %c0_12] : memref<256x128xbf16, #tpu.memory_space<vmem>>, vector<256x128xbf16>
      %cst = arith.constant dense<0.000000e+00> : vector<8x128xf32>
      %24 = tpu.matmul %21, %23, %cst {dimension_numbers = #tpu.dot_dimension_numbers<[1], [0], [0], [1], [0, 0, 1, 1], [], []>} : vector<8x256xbf16>, vector<256x128xbf16>, vector<8x128xf32> -> vector<8x128xf32>
      %25 = arith.addf %18, %24 : vector<8x128xf32>
      %c0_13 = arith.constant 0 : index
      %c0_14 = arith.constant 0 : index
      %26 = vector.load %arg9[%c0_13, %c0_14] : memref<8x128xf32, #tpu.memory_space<vmem>>, vector<8x128xf32>
      tpu.vector_store %arg9[%c0_13, %c0_14], %25 {strides = array<i32>} : memref<8x128xf32, #tpu.memory_space<vmem>>, vector<8x128xf32>,
    } else {
    }
    %c0_i32_4 = arith.constant 0 : i32
    %10 = arith.cmpi eq, %arg1, %c0_i32_4 : i32
    %c0_i32_5 = arith.constant 0 : i32
    %11 = arith.cmpi eq, %arg2, %c0_i32_5 : i32
    %12 = arith.andi %10, %11 : i1
    %13 = arith.extui %12 : i1 to i32
    %c0_i32_6 = arith.constant 0 : i32
    %14 = arith.cmpi ne, %13, %c0_i32_6 : i32
    scf.if %14 {
      %c0 = arith.constant 0 : index
      %c0_8 = arith.constant 0 : index
      %18 = vector.load %arg6[%c0, %c0_8] : memref<8x8xbf16, #tpu.memory_space<vmem>>, vector<8x8xbf16>
      %c0_9 = arith.constant 0 : index
      %c0_10 = arith.constant 0 : index
      %19 = vector.load %arg9[%c0_9, %c0_10] : memref<8x128xf32, #tpu.memory_space<vmem>>, vector<8x128xf32>
      %20 = arith.truncf %19 : vector<8x128xf32> to vector<8x128xbf16>
      %cst = arith.constant dense<0.000000e+00> : vector<8x128xf32>
      %21 = tpu.matmul %18, %20, %cst {dimension_numbers = #tpu.dot_dimension_numbers<[1], [0], [0], [1], [0, 0, 1, 1], [], []>} : vector<8x8xbf16>, vector<8x128xbf16>, vector<8x128xf32> -> vector<8x128xf32>
      %c0_11 = arith.constant 0 : index
      %c0_12 = arith.constant 0 : index
      %22 = vector.load %arg7[%c0_11, %c0_12] : memref<8x128xf32, #tpu.memory_space<vmem>>, vector<8x128xf32>
      %23 = arith.addf %21, %22 : vector<8x128xf32>
      %cst_13 = arith.constant 0.000000e+00 : f32
      %24 = vector.broadcast %cst_13 : f32 to vector<8x128xf32>
      %25 = arith.maximumf %23, %24 : vector<8x128xf32>
      %26 = arith.truncf %25 : vector<8x128xf32> to vector<8x128xbf16>
      %c0_14 = arith.constant 0 : index
      %c0_15 = arith.constant 0 : index
      %27 = vector.load %arg10[%c0_14, %c0_15] : memref<8x128xbf16, #tpu.memory_space<vmem>>, vector<8x128xbf16>
      tpu.vector_store %arg10[%c0_14, %c0_15], %26 {strides = array<i32>} : memref<8x128xbf16, #tpu.memory_space<vmem>>, vector<8x128xbf16>,
    } else {
    }
    %c1_i32 = arith.constant 1 : i32
    %15 = arith.cmpi eq, %arg1, %c1_i32 : i32
    %16 = arith.extui %15 : i1 to i32
    %c0_i32_7 = arith.constant 0 : i32
    %17 = arith.cmpi ne, %16, %c0_i32_7 : i32
    scf.if %17 {
      %c0 = arith.constant 0 : index
      %c0_8 = arith.constant 0 : index
      %18 = vector.load %arg10[%c0, %c0_8] : memref<8x128xbf16, #tpu.memory_space<vmem>>, vector<8x128xbf16>
      %c0_9 = arith.constant 0 : index
      %19 = arith.index_cast %1 : i32 to index
      %20 = vector.load %arg5[%c0_9, %19] : memref<128x256xbf16, #tpu.memory_space<vmem>>, vector<128x256xbf16>
      %cst = arith.constant dense<0.000000e+00> : vector<8x256xf32>
      %21 = tpu.matmul %18, %20, %cst {dimension_numbers = #tpu.dot_dimension_numbers<[1], [0], [0], [1], [0, 0, 1, 1], [], []>} : vector<8x128xbf16>, vector<128x256xbf16>, vector<8x256xf32> -> vector<8x256xf32>
      %22 = arith.truncf %21 : vector<8x256xf32> to vector<8x256xbf16>
      %c0_10 = arith.constant 0 : index
      %c0_11 = arith.constant 0 : index
      %c0_12 = arith.constant 0 : index
      %23 = vector.load %arg8[%c0_10, %c0_11, %c0_12] : memref<1x8x256xbf16, #tpu.memory_space<vmem>>, vector<1x8x256xbf16>
      %24 = vector.shape_cast %23 : vector<1x8x256xbf16> to vector<8x256xbf16>
      %25 = vector.shape_cast %22 : vector<8x256xbf16> to vector<1x8x256xbf16>
      tpu.vector_store %arg8[%c0_10, %c0_11, %c0_12], %25 {strides = array<i32>} : memref<1x8x256xbf16, #tpu.memory_space<vmem>>, vector<1x8x256xbf16>,
    } else {
    }
    return
  }
  func.func @transform_0(%arg0: i32, %arg1: i32, %arg2: i32) -> (i32, i32, i32) {
    %c1_i32 = arith.constant 1 : i32
    %0 = arith.subi %c1_i32, %arg1 : i32
    %1 = arith.muli %arg2, %0 : i32
    %c0_i32 = arith.constant 0 : i32
    %2 = arith.muli %c0_i32, %arg1 : i32
    %3 = arith.addi %1, %2 : i32
    %c0_i32_0 = arith.constant 0 : i32
    %c0_i32_1 = arith.constant 0 : i32
    return %arg0, %c0_i32_0, %3 : i32, i32, i32
  }
  func.func @transform_1(%arg0: i32, %arg1: i32, %arg2: i32) -> (i32, i32) {
    %c0_i32 = arith.constant 0 : i32
    %c0_i32_0 = arith.constant 0 : i32
    %c0_i32_1 = arith.constant 0 : i32
    return %c0_i32, %c0_i32_0 : i32, i32
  }
  func.func @transform_2(%arg0: i32, %arg1: i32, %arg2: i32) -> (i32, i32) {
    %c0_i32 = arith.constant 0 : i32
    %c0_i32_0 = arith.constant 0 : i32
    %c0_i32_1 = arith.constant 0 : i32
    return %c0_i32, %c0_i32_0 : i32, i32
  }
  func.func @transform_3(%arg0: i32, %arg1: i32, %arg2: i32) -> (i32, i32) {
    %c0_i32 = arith.constant 0 : i32
    %c0_i32_0 = arith.constant 0 : i32
    %c0_i32_1 = arith.constant 0 : i32
    return %c0_i32, %c0_i32_0 : i32, i32
  }
  func.func @transform_4(%arg0: i32, %arg1: i32, %arg2: i32) -> (i32, i32) {
    %c0_i32 = arith.constant 0 : i32
    %c0_i32_0 = arith.constant 0 : i32
    %c0_i32_1 = arith.constant 0 : i32
    return %c0_i32, %c0_i32_0 : i32, i32
  }
  func.func @transform_5(%arg0: i32, %arg1: i32, %arg2: i32) -> (i32, i32, i32) {
    %0 = arith.muli %arg2, %arg1 : i32
    %c0_i32 = arith.constant 0 : i32
    %c0_i32_0 = arith.constant 0 : i32
    return %arg0, %c0_i32, %0 : i32, i32, i32
  }
}

module attributes {stable_mosaic.version = 11 : i64} {
  func.func @_psp_kernel(%arg0: i32, %arg1: i32, %arg2: i32, %arg3: memref<1x8x256xf32, #tpu.memory_space<vmem>>, %arg4: memref<256x128xbf16, #tpu.memory_space<vmem>>, %arg5: memref<128x256xbf16, #tpu.memory_space<vmem>>, %arg6: memref<8x8xbf16, #tpu.memory_space<vmem>>, %arg7: memref<8x128xf32, #tpu.memory_space<vmem>>, %arg8: memref<1x8x256xbf16, #tpu.memory_space<vmem>>, %arg9: memref<8x128xf32, #tpu.memory_space<vmem>>, %arg10: memref<8x128xbf16, #tpu.memory_space<vmem>>) attributes {dimension_semantics = [#tpu.dimension_semantics<parallel>, #tpu.dimension_semantics<arbitrary>, #tpu.dimension_semantics<arbitrary>], iteration_bounds = array<i64: 2, 2, 1>, scalar_prefetch = 0 : i64, scratch_operands = 2 : i64, tpu.core_type = #tpu.core_type<tc>, window_params = [{transform_indices = @transform_0, window_bounds = array<i64: 1, 8, 256>}, {pipeline_mode = #tpu.pipeline_mode<synchronous>, transform_indices = @transform_1, window_bounds = array<i64: 256, 128>}, {pipeline_mode = #tpu.pipeline_mode<synchronous>, transform_indices = @transform_2, window_bounds = array<i64: 128, 256>}, {pipeline_mode = #tpu.pipeline_mode<synchronous>, transform_indices = @transform_3, window_bounds = array<i64: 8, 8>}, {pipeline_mode = #tpu.pipeline_mode<synchronous>, transform_indices = @transform_4, window_bounds = array<i64: 8, 128>}, {transform_indices = @transform_5, window_bounds = array<i64: 1, 8, 256>}]} {
    %c256_i32 = arith.constant 256 : i32
    %0 = arith.muli %arg2, %c256_i32 : i32
    %1 = tpu.assume_multiple %0, 256 : i32
    %c0_i32 = arith.constant 0 : i32
    %2 = arith.cmpi eq, %arg1, %c0_i32 : i32
    %c0_i32_0 = arith.constant 0 : i32
    %3 = arith.cmpi eq, %arg2, %c0_i32_0 : i32
    %4 = arith.andi %2, %3 : i1
    %5 = arith.extui %4 : i1 to i32
    %c0_i32_1 = arith.constant 0 : i32
    %6 = arith.cmpi ne, %5, %c0_i32_1 : i32
    scf.if %6 {
      %cst = arith.constant 0.000000e+00 : f32
      %18 = vector.broadcast %cst : f32 to vector<8x128xf32>
      %c0 = arith.constant 0 : index
      %c0_8 = arith.constant 0 : index
      %19 = vector.load %arg9[%c0, %c0_8] : memref<8x128xf32, #tpu.memory_space<vmem>>, vector<8x128xf32>
      tpu.vector_store %arg9[%c0, %c0_8], %18 {strides = array<i32>} : memref<8x128xf32, #tpu.memory_space<vmem>>, vector<8x128xf32>,
    } else {
    }
    %c0_i32_2 = arith.constant 0 : i32
    %7 = arith.cmpi eq, %arg1, %c0_i32_2 : i32
    %8 = arith.extui %7 : i1 to i32
    %c0_i32_3 = arith.constant 0 : i32
    %9 = arith.cmpi ne, %8, %c0_i32_3 : i32
    scf.if %9 {
      %c0 = arith.constant 0 : index
      %c0_8 = arith.constant 0 : index
      %18 = vector.load %arg9[%c0, %c0_8] : memref<8x128xf32, #tpu.memory_space<vmem>>, vector<8x128xf32>
      %c0_9 = arith.constant 0 : index
      %c0_10 = arith.constant 0 : index
      %c0_11 = arith.constant 0 : index
      %19 = vector.load %arg3[%c0_9, %c0_10, %c0_11] : memref<1x8x256xf32, #tpu.memory_space<vmem>>, vector<1x8x256xf32>
      %20 = vector.shape_cast %19 : vector<1x8x256xf32> to vector<8x256xf32>
      %21 = arith.truncf %20 : vector<8x256xf32> to vector<8x256xbf16>
      %22 = arith.index_cast %1 : i32 to index
      %c0_12 = arith.constant 0 : index
      %23 = vector.load %arg4[%22, %c0_12] : memref<256x128xbf16, #tpu.memory_space<vmem>>, vector<256x128xbf16>
      %cst = arith.constant dense<0.000000e+00> : vector<8x128xf32>
      %24 = tpu.matmul %21, %23, %cst {dimension_numbers = #tpu.dot_dimension_numbers<[1], [0], [0], [1], [0, 0, 1, 1], [], []>} : vector<8x256xbf16>, vector<256x128xbf16>, vector<8x128xf32> -> vector<8x128xf32>
      %25 = arith.addf %18, %24 : vector<8x128xf32>
      %c0_13 = arith.constant 0 : index
      %c0_14 = arith.constant 0 : index
      %26 = vector.load %arg9[%c0_13, %c0_14] : memref<8x128xf32, #tpu.memory_space<vmem>>, vector<8x128xf32>
      tpu.vector_store %arg9[%c0_13, %c0_14], %25 {strides = array<i32>} : memref<8x128xf32, #tpu.memory_space<vmem>>, vector<8x128xf32>,
    } else {
    }
    %c0_i32_4 = arith.constant 0 : i32
    %10 = arith.cmpi eq, %arg1, %c0_i32_4 : i32
    %c0_i32_5 = arith.constant 0 : i32
    %11 = arith.cmpi eq, %arg2, %c0_i32_5 : i32
    %12 = arith.andi %10, %11 : i1
    %13 = arith.extui %12 : i1 to i32
    %c0_i32_6 = arith.constant 0 : i32
    %14 = arith.cmpi ne, %13, %c0_i32_6 : i32
    scf.if %14 {
      %c0 = arith.constant 0 : index
      %c0_8 = arith.constant 0 : index
      %18 = vector.load %arg6[%c0, %c0_8] : memref<8x8xbf16, #tpu.memory_space<vmem>>, vector<8x8xbf16>
      %c0_9 = arith.constant 0 : index
      %c0_10 = arith.constant 0 : index
      %19 = vector.load %arg9[%c0_9, %c0_10] : memref<8x128xf32, #tpu.memory_space<vmem>>, vector<8x128xf32>
      %20 = arith.truncf %19 : vector<8x128xf32> to vector<8x128xbf16>
      %cst = arith.constant dense<0.000000e+00> : vector<8x128xf32>
      %21 = tpu.matmul %18, %20, %cst {dimension_numbers = #tpu.dot_dimension_numbers<[1], [0], [0], [1], [0, 0, 1, 1], [], []>} : vector<8x8xbf16>, vector<8x128xbf16>, vector<8x128xf32> -> vector<8x128xf32>
      %c0_11 = arith.constant 0 : index
      %c0_12 = arith.constant 0 : index
      %22 = vector.load %arg7[%c0_11, %c0_12] : memref<8x128xf32, #tpu.memory_space<vmem>>, vector<8x128xf32>
      %23 = arith.addf %21, %22 : vector<8x128xf32>
      %cst_13 = arith.constant 0.000000e+00 : f32
      %24 = vector.broadcast %cst_13 : f32 to vector<8x128xf32>
      %25 = arith.maximumf %23, %24 : vector<8x128xf32>
      %26 = arith.truncf %25 : vector<8x128xf32> to vector<8x128xbf16>
      %c0_14 = arith.constant 0 : index
      %c0_15 = arith.constant 0 : index
      %27 = vector.load %arg10[%c0_14, %c0_15] : memref<8x128xbf16, #tpu.memory_space<vmem>>, vector<8x128xbf16>
      tpu.vector_store %arg10[%c0_14, %c0_15], %26 {strides = array<i32>} : memref<8x128xbf16, #tpu.memory_space<vmem>>, vector<8x128xbf16>,
    } else {
    }
    %c1_i32 = arith.constant 1 : i32
    %15 = arith.cmpi eq, %arg1, %c1_i32 : i32
    %16 = arith.extui %15 : i1 to i32
    %c0_i32_7 = arith.constant 0 : i32
    %17 = arith.cmpi ne, %16, %c0_i32_7 : i32
    scf.if %17 {
      %c0 = arith.constant 0 : index
      %c0_8 = arith.constant 0 : index
      %18 = vector.load %arg10[%c0, %c0_8] : memref<8x128xbf16, #tpu.memory_space<vmem>>, vector<8x128xbf16>
      %c0_9 = arith.constant 0 : index
      %19 = arith.index_cast %1 : i32 to index
      %20 = vector.load %arg5[%c0_9, %19] : memref<128x256xbf16, #tpu.memory_space<vmem>>, vector<128x256xbf16>
      %cst = arith.constant dense<0.000000e+00> : vector<8x256xf32>
      %21 = tpu.matmul %18, %20, %cst {dimension_numbers = #tpu.dot_dimension_numbers<[1], [0], [0], [1], [0, 0, 1, 1], [], []>} : vector<8x128xbf16>, vector<128x256xbf16>, vector<8x256xf32> -> vector<8x256xf32>
      %22 = arith.truncf %21 : vector<8x256xf32> to vector<8x256xbf16>
      %c0_10 = arith.constant 0 : index
      %c0_11 = arith.constant 0 : index
      %c0_12 = arith.constant 0 : index
      %23 = vector.load %arg8[%c0_10, %c0_11, %c0_12] : memref<1x8x256xbf16, #tpu.memory_space<vmem>>, vector<1x8x256xbf16>
      %24 = vector.shape_cast %23 : vector<1x8x256xbf16> to vector<8x256xbf16>
      %25 = vector.shape_cast %22 : vector<8x256xbf16> to vector<1x8x256xbf16>
      tpu.vector_store %arg8[%c0_10, %c0_11, %c0_12], %25 {strides = array<i32>} : memref<1x8x256xbf16, #tpu.memory_space<vmem>>, vector<1x8x256xbf16>,
    } else {
    }
    return
  }
  func.func @transform_0(%arg0: i32, %arg1: i32, %arg2: i32) -> (i32, i32, i32) {
    %c1_i32 = arith.constant 1 : i32
    %0 = arith.subi %c1_i32, %arg1 : i32
    %1 = arith.muli %arg2, %0 : i32
    %c0_i32 = arith.constant 0 : i32
    %2 = arith.muli %c0_i32, %arg1 : i32
    %3 = arith.addi %1, %2 : i32
    %c0_i32_0 = arith.constant 0 : i32
    %c0_i32_1 = arith.constant 0 : i32
    return %arg0, %c0_i32_0, %3 : i32, i32, i32
  }
  func.func @transform_1(%arg0: i32, %arg1: i32, %arg2: i32) -> (i32, i32) {
    %c0_i32 = arith.constant 0 : i32
    %c0_i32_0 = arith.constant 0 : i32
    %c0_i32_1 = arith.constant 0 : i32
    return %c0_i32, %c0_i32_0 : i32, i32
  }
  func.func @transform_2(%arg0: i32, %arg1: i32, %arg2: i32) -> (i32, i32) {
    %c0_i32 = arith.constant 0 : i32
    %c0_i32_0 = arith.constant 0 : i32
    %c0_i32_1 = arith.constant 0 : i32
    return %c0_i32, %c0_i32_0 : i32, i32
  }
  func.func @transform_3(%arg0: i32, %arg1: i32, %arg2: i32) -> (i32, i32) {
    %c0_i32 = arith.constant 0 : i32
    %c0_i32_0 = arith.constant 0 : i32
    %c0_i32_1 = arith.constant 0 : i32
    return %c0_i32, %c0_i32_0 : i32, i32
  }
  func.func @transform_4(%arg0: i32, %arg1: i32, %arg2: i32) -> (i32, i32) {
    %c0_i32 = arith.constant 0 : i32
    %c0_i32_0 = arith.constant 0 : i32
    %c0_i32_1 = arith.constant 0 : i32
    return %c0_i32, %c0_i32_0 : i32, i32
  }
  func.func @transform_5(%arg0: i32, %arg1: i32, %arg2: i32) -> (i32, i32, i32) {
    %0 = arith.muli %arg2, %arg1 : i32
    %c0_i32 = arith.constant 0 : i32
    %c0_i32_0 = arith.constant 0 : i32
    return %arg0, %c0_i32, %0 : i32, i32, i32
  }
}

</mosaic_0001>

<bundles_post_ra>
// kernel: tpu_custom_call.1
= control target key start
LH: loop header
LB: loop body
LE: loop exit
PB: predicated region body
PF: predicated region fallthrough
CT: control target
= control target key end

     0   :  { %s1658_s0 = inlined_call_operand.hbm [shape: f32[2,8,256], index: 0, kind: input, shape index: {}]   ;;  %s1659_s1 = inlined_call_operand.hbm [shape: bf16[256,128], index: 1, kind: input, shape index: {}]   ;;  %s1660_s2 = inlined_call_operand.hbm [shape: bf16[128,256], index: 2, kind: input, shape index: {}]   ;;  %s1661_s3 = inlined_call_operand.hbm [shape: bf16[8,8], index: 3, kind: input, shape index: {}]   ;;  %s1662_s4 = inlined_call_operand.hbm [shape: f32[8,128], index: 4, kind: input, shape index: {}]   ;;  %s1663_s5 = inlined_call_operand.hbm [shape: bf16[2,8,256], index: 5, kind: output, shape index: {}]  }
   0x1   :  { %1664 = sst [smem:[#allocation18_spill]] %s1659_s1 }
   0x2   :  { %1665 = sst [smem:[#allocation19_spill]] %s1660_s2 }
   0x3   :  { %1666 = sst [smem:[#allocation20_spill]] %s1661_s3 }
   0x4   :  { %10 = vsyncpa [#allocation5], 0 }
   0x5   :  { %12 = vsyncpa [#allocation5 + $0x1], 0 }
   0x6   :  { %13 = vsyncpa [#allocation8], 0 }
   0x7   :  { %14 = vsyncpa [#allocation11], 0 }
   0x8   :  { %15 = vsyncpa [#allocation6], 0 }
   0x9   :  { %17 = vsyncpa [#allocation6 + $0x1], 0  ;;  %s1446_s18 = smov 0   ;;  %s1448_s19 = smov 0  }
   0xa   :  { %s1450_s20 = smov 0   ;;  %s1452_s21 = smov 0  }
   0xb   :  { %s1454_s22 = smov 0   ;;  %s1456_s23 = smov 0  }
   0xc   :  { %s1458_s24 = smov 0   ;;  %s1460_s25 = smov 0  }
   0xd LB: > { %s835_s26 = sadd.s32 4294967295, %s1405_s25   ;;  %p837_p0 = scmp.ge.s32.totalorder %s1405_s25, 1  ;;  %s1405_s25 = sphi %s1460_s25, %s23_s25   ;;  %s1401_s24 = sphi %s1458_s24, %s1683_s24   ;;  %s1397_s23 = sphi %s1456_s23, %s1682_s23   ;;  %s1393_s22 = sphi %s1454_s22, %s1681_s22   ;;  %s1389_s21 = sphi %s1452_s21, %s1680_s21   ;;  %s1385_s20 = sphi %s1450_s20, %s1679_s20   ;;  %s1381_s19 = sphi %s1448_s19, %s1678_s19   ;;  %s1377_s18 = sphi %s1446_s18, %s1677_s18  }
   0xe   : > { %p1490_p1 = scmp.eq.s32.totalorder %s835_s26, 0  ;;  %p193_p2 = scmp.lt.s32.totalorder %s1405_s25, 5 }
   0xf   : > { %s1668_s1 = sld [smem:[#allocation18_spill]]  ;;  %s1407_s7 = smov [#allocation7]  }
  0x10   : > { %p1498_p3 = pnand %p837_p0, %p193_p2  ;;  %s206_s8 = sshll.u32 %s1407_s7, 4  ;;  %s207_s8 = int_to_ptr.vmem [resolvable:$true] %s206_s8 }
  0x11   : > { %s1671_s3 = sld [smem:[#allocation20_spill]]  ;;  %s1408_s13 = smov 64  }
  0x12   : > { %p1045_p4 = pneg %p1498_p3  ;;  %s1409_s14 = smov 4  }
  0x13   : > { %s1410_s15 = smov [#allocation10]   ;;  %s1672_s2 = sld [smem:[#allocation19_spill]] }
  0x14   : > { %p1506_p5 = pnand %p1045_p4, %p1490_p1  ;;  %s235_s16 = sshll.u32 %s1410_s15, 4  ;;  %s236_s16 = int_to_ptr.vmem [resolvable:$true] %s235_s16 }
  0x15   : > { %s204_s30 = sshll.u32 %s1668_s1, 4  ;;  %s1411_s7 = smov [#allocation9]   ;;  %s205_s30 = int_to_ptr.hbm [resolvable:$true] %s204_s30 }
  0x16   : > { %1048 = dma.hbm_to_vmem [thread:$0]  (!%p1506_p5), %s205_s30, 2048, %s207_s8, [#allocation8], %s1408_s13, %s1408_s13, %s1409_s14  }
  0x17   : > { %s233_s12 = sshll.u32 %s1671_s3, 4  ;;  %s220_s10 = sshll.u32 %s1411_s7, 4  ;;  %s234_s12 = int_to_ptr.hbm [resolvable:$true] %s233_s12  ;;  %s221_s10 = int_to_ptr.vmem [resolvable:$true] %s220_s10 }
  0x18   : > { %1054 = dma.hbm_to_vmem [thread:$0]  (!%p1506_p5), %s234_s12, 64, %s236_s16, [#allocation11]  }
  0x19   : > { %s218_s29 = sshll.u32 %s1672_s2, 4  ;;  %s245_s11 = sshll.u32 %s1662_s4, 4  ;;  %s219_s29 = int_to_ptr.hbm [resolvable:$true] %s218_s29  ;;  %s246_s11 = int_to_ptr.hbm [resolvable:$true] %s245_s11 }
  0x1a   : > { %s1412_s13 = smov 128   ;;  %s1413_s14 = smov 8  }
  0x1b   : > { %1051 = dma.hbm_to_vmem [thread:$0]  (!%p1506_p5), %s219_s29, 2048, %s221_s10, [#allocation8], %s1412_s13, %s1412_s13, %s1413_s14  }
  0x1c   : > { %s1414_s12 = smov [#allocation12]   ;;  %s38_s16 = sadd.s32 1, %s1397_s23 }
  0x1d   : > { %s247_s15 = sshll.u32 %s1414_s12, 4  ;;  %p40_p6 = scmp.ge.s32.totalorder %s38_s16, 2  ;;  %s248_s15 = int_to_ptr.vmem [resolvable:$true] %s247_s15 }
  0x1e   : > { %1057 = dma.hbm_to_vmem [thread:$0]  (!%p1506_p5), %s246_s11, 128, %s248_s15, [#allocation11]  }
  0x1f   : > { %s42_s17 = sadd.s32 1, %s1401_s24  ;;  %s836_s28 = sadd.s32 4294967294, %s1405_s25  }
  0x20   : > { %p62_p7 = scmp.ne.s32.totalorder %s1385_s20, %s1381_s19  ;;  %s1685_s16 = smov (%p40_p6, %s38_s16), 0 }
  0x21   : > { %s1687_s17 = smov (!%p40_p6, %s42_s17), %s1401_s24  ;;  %p63_p8 = scmp.eq.s32.totalorder %s1405_s25, 0 }
  0x22   : > { %p68_p9 = scmp.ne.s32.totalorder %s1381_s19, %s1377_s18  ;;  %p44_p10 = scmp.ge.s32.totalorder %s1687_s17, 2 }
  0x23   : > { %p180_p11 = scmp.eq.s32.totalorder %s835_s26, 3  ;;  %s55_s9 = sadd.s32 1, %s1385_s20 }
  0x24   : > { %p1543_p12 = por %p1490_p1, %p68_p9  ;;  %s1689_s17 = smov (%p44_p10, %s1687_s17), 0 }
  0x25   : > { %p1552_p13 = por %p180_p11, %p62_p7  ;;  %p186_p0 = scmp.eq.s32.totalorder %s836_s28, 3 }
  0x26   : > { %s50_s10 = ssub.s32 %s1401_s24, %s1689_s17  ;;  %p1561_p2 = por %p63_p8, %p62_p7 }
  0x27   : > { %p53_p4 = scmp.eq.s32.totalorder %s50_s10, 0  ;;  %p1565_p5 = por %p186_p0, %p68_p9 }
  0x28   : > { %s258_s8 = sand.u32 1, %s1385_s20   ;;  %s990_s11 = sshll.u32 %s1401_s24, 4 }
  0x29   : > { %s1572_s13 = scalar_select %p53_p4, %s1385_s20, %s55_s9  }
  0x2a   : > { %p1070_p6 = scmp.lt.s32.totalorder %s1405_s25, 4  ;;  %s843_s14 = sshll.u32 %s258_s8, 4 }
  0x2b   : > { %s271_s28 = scalar_lea.hbm %s1658_s0, %s990_s11  ;;  %s262_s2 = scalar_lea.vmem [#allocation4], %s843_s14 }
  0x2c   : > { %s273_s1 = sshll.u32 %s271_s28, 4  ;;  %s275_s3 = sshll.u32 %s262_s2, 4  ;;  %s274_s1 = int_to_ptr.hbm [resolvable:$true] %s273_s1  ;;  %s276_s3 = int_to_ptr.vmem [resolvable:$true] %s275_s3 }
  0x2d   : > { %p1059_p7 = pnand %p1070_p6, %p1561_p2  ;;  %s259_s10 = scalar_lea.sflag [#allocation5], %s258_s8 }
  0x2e   : > { %284 = sbr.rel (%p1498_p3) target bundleno = 572 (0x23c), region = 40  ;;  %s1583_s9 = sand.u32 (!%p1498_p3), 1, %s1381_s19  }
  0x2f   : > { %1061 = dma.hbm_to_vmem [thread:$0]  (!%p1059_p7), %s274_s1, 256, %s276_s3, %s259_s10  }
  0x30   : > { %s847_s12 = sshll.u32 (!%p1498_p3), %s1583_s9, 4  ;;  %s287_s11 = scalar_lea.sflag (!%p1498_p3), [#allocation5], %s1583_s9 }
  0x31   : > { %s1587_s15 = scalar_lea.vmem (!%p1498_p3), [#allocation4], %s847_s12 }
  0x33   : > { %1360 = dma.done.wait (%p1543_p12), %s287_s11, 256  }
  0x34   : > { %1362 = vsyncadd (%p1543_p12), %s287_s11, 4294967040 }
  0x35   : > { %1364 = dma.done.wait (%p1490_p1), [#allocation8], 4096  }
  0x36   : > { %1366 = vsyncadd (%p1490_p1), [#allocation8], 4294963200 }
  0x37   : > { %1368 = dma.done.wait (%p1490_p1), [#allocation11], 192  }
  0x38   : > { %1370 = vsyncadd (%p1490_p1), [#allocation11], 4294967104  ;;  %s852_s1 = sshll.u32 %s1583_s9, 3  ;;  %p345_p3 = scmp.eq.s32.totalorder %s1389_s21, 0 }
  0x39   : > { %s1603_s2 = scalar_lea.vmem [#allocation13], %s852_s1  ;;  %v1415_v0 = vmov (%p345_p3), 0.0  }
  0x3a   : > { %350 = sbr.rel (!%p345_p3) target bundleno = 63 (0x3f), region = 64  ;;  %351 = vst [vmem:[#allocation2] sm:$0xff] (%p345_p3), %v1415_v0 }
  0x3f PF: > { %p854_p8 = scmp.ne.s32.totalorder %s1389_s21, 0 }
  0x41   : > { %354 = sbr.rel (%p854_p8) target bundleno = 237 (0xed), region = 68 }
  0x46   : > { %v999_v1 = vld [vmem:[#allocation7 + $0x38] sm:$0xff]  ;;  %v998_v3 = vld [vmem:[#allocation7 + $0x30] sm:$0xff]  ;;  %v997_v5 = vld [vmem:[#allocation7 + $0x28] sm:$0xff] }
  0x47   : > { %v1007_v2 = vld [vmem:[#allocation7 + $0x78] sm:$0xff]  ;;  %492 = vmatpush.bf16.msra.mxu0 %v999_v1  ;;  %v1006_v4 = vld [vmem:[#allocation7 + $0x70] sm:$0xff]  ;;  %v1005_v6 = vld [vmem:[#allocation7 + $0x68] sm:$0xff] }
  0x48   : > { %505 = vmatpush.bf16.msra.mxu1 %v1007_v2  ;;  %v996_v7 = vld [vmem:[#allocation7 + $0x20] sm:$0xff]  ;;  %v995_v9 = vld [vmem:[#allocation7 + $0x18] sm:$0xff]  ;;  %v994_v11 = vld [vmem:[#allocation7 + $0x10] sm:$0xff] }
  0x49   : > { %v1004_v8 = vld [vmem:[#allocation7 + $0x60] sm:$0xff]  ;;  %v1003_v10 = vld [vmem:[#allocation7 + $0x58] sm:$0xff]  ;;  %v1002_v12 = vld [vmem:[#allocation7 + $0x50] sm:$0xff] }
  0x4a   : > { %v993_v13 = vld [vmem:[#allocation7 + $0x8] sm:$0xff]  ;;  %v992_v15 = vld [vmem:[#allocation7] sm:$0xff]  ;;  %v355_v22 = vld [vmem:[#allocation2] sm:$0xff] }
  0x4b   : > { %493 = vmatpush.bf16.msra.mxu0 %v998_v3  ;;  %v1001_v14 = vld [vmem:[#allocation7 + $0x48] sm:$0xff]  ;;  %v1000_v16 = vld [vmem:[#allocation7 + $0x40] sm:$0xff] }
  0x4c   : > { %506 = vmatpush.bf16.msra.mxu1 %v1006_v4  ;;  %v356_v17 = vld [vmem:[%s1587_s15] sm:$0xff]  ;;  %v357_v18 = vld [vmem:[%s1587_s15 + $0x8] sm:$0xff] }
  0x4d   : > { %v358_v19 = vpack.c.bf16 %v356_v17, %v356_v17  ;;  %v359_v20 = vpack.c.bf16 %v357_v18, %v357_v18 }
  0x4f   : > { %494 = vmatpush.bf16.msra.mxu0 %v997_v5 }
  0x50   : > { %507 = vmatpush.bf16.msra.mxu1 %v1005_v6 }
  0x53   : > { %495 = vmatpush.bf16.msra.mxu0 %v996_v7 }
  0x54   : > { %508 = vmatpush.bf16.msra.mxu1 %v1004_v8 }
  0x57   : > { %496 = vmatpush.bf16.msra.mxu0 %v995_v9 }
  0x58   : > { %509 = vmatpush.bf16.msra.mxu1 %v1003_v10 }
  0x5b   : > { %497 = vmatpush.bf16.msra.mxu0 %v994_v11 }
  0x5c   : > { %510 = vmatpush.bf16.msra.mxu1 %v1002_v12 }
  0x5f   : > { %498 = vmatpush.bf16.msra.mxu0 %v993_v13 }
  0x60   : > { %511 = vmatpush.bf16.msra.mxu1 %v1001_v14 }
  0x63   : > { %499 = vmatpush.bf16.msra.mxu0 %v992_v15 }
  0x64   : > { %512 = vmatpush.bf16.msra.mxu1 %v1000_v16 }
  0x66   : > { %500 = vmatmul.bf16.vlgmr.msra.gmra.mxu0 %v358_v19 }
  0x67   : > { %513 = vmatmul.bf16.vlgmr.msra.gmra.mxu1 %v359_v20 }
  0xe3   : > { %v501_v21 = vpop.f32.mrf.mxu0 }
  0xe4   : > { %v514_v23 = vpop.f32.mrf.mxu1 }
  0xe5   : > { %v515_v24 = vadd.f32 %v514_v23, %v501_v21 }
  0xe7   : > { %v518_v25 = vadd.f32 %v515_v24, %v355_v22 }
  0xe9   : > { %519 = vst [vmem:[#allocation2] sm:$0xff] %v518_v25 }
  0xeb   : > { %v503_v26 = vpop.f32.mrf.mxu0 }
  0xec   : > { %v516_v27 = vpop.f32.mrf.mxu1 }
  0xed PF: > { %521 = sbr.rel (!%p345_p3) target bundleno = 381 (0x17d), region = 72  ;;  %vm530_vm0 = vcmask (%p345_p3), 1043456   ;;  %v522_v31 = vld [vmem:[#allocation10] sm:$0xf] (%p345_p3)  ;;  %vm526_vm1 = vcmask (%p345_p3), 64512   ;;  %v525_v32 = vld [vmem:[#allocation12] sm:$0xff] (%p345_p3) }
  0xf0   : > { %v523_v28 = vld [vmem:[#allocation2] sm:$0xff] (%p345_p3) }
  0xf1   : > { %v524_v29 = vpack.c.bf16 (%p345_p3), %v523_v28, %v523_v28 }
  0xf3   : > { %v532_v30 = vsel %vm530_vm0, %v524_v29, 0 }
  0xf4   : > { %541 = vmatpush.bf16.msra.mxu0 %v532_v30 }
  0xf7   : > { %919 = vmatmul.msk.bf16.vlgmr.msra.gmra.mxu0 %vm526_vm1, %v522_v31 }
 0x174   : > { %v543_v33 = vpop.f32.mrf.mxu0 }
 0x175   : > { %v544_v34 = vadd.f32 %v543_v33, %v525_v32 }
 0x177   : > { %v547_v35 = vmax.f32 %v544_v34, 0.0 }
 0x179   : > { %v548_v36 = vpack.c.bf16 %v547_v35, %v547_v35 }
 0x17b   : > { %549 = vst [vmem:[#allocation3] sm:$0xf] %v548_v36 }
 0x17c   : > { %v545_v37 = vpop.f32.mrf.mxu0 }
 0x17d PF: > { %p920_p1 = scmp.ne.s32.totalorder %s1389_s21, 1 }
 0x17f   : > { %553 = sbr.rel (%p920_p1) target bundleno = 557 (0x22d), region = 76 }
 0x184   : > { %v979_v38 = vld [vmem:[#allocation9 + $0x70] sm:$0xf]  ;;  %v1023_v39 = vld [vmem:[#allocation9 + $0x74] sm:$0xf0]  ;;  %v1022_v40 = vld [vmem:[#allocation9 + $0x74] sm:$0xf] }
 0x185   : > { %v980_v41 = vor.u32 %v1023_v39, %v979_v38  ;;  %v981_v42 = vld [vmem:[#allocation9 + $0x78] sm:$0xf0]  ;;  %v971_v43 = vld [vmem:[#allocation9 + $0x60] sm:$0xf]  ;;  %v1021_v44 = vld [vmem:[#allocation9 + $0x64] sm:$0xf0] }
 0x186   : > { %v984_v45 = vor.u32 %v1022_v40, %v981_v42  ;;  %v1020_v46 = vld [vmem:[#allocation9 + $0x64] sm:$0xf]  ;;  %v973_v47 = vld [vmem:[#allocation9 + $0x68] sm:$0xf0]  ;;  %v972_v48 = vor.u32 %v1021_v44, %v971_v43  ;;  %v963_v50 = vld [vmem:[#allocation9 + $0x50] sm:$0xf] }
 0x187   : > { %655 = vmatpush.bf16.msra.mxu0 %v980_v41  ;;  %v976_v49 = vor.u32 %v1020_v46, %v973_v47  ;;  %v1019_v51 = vld [vmem:[#allocation9 + $0x54] sm:$0xf0]  ;;  %v1018_v52 = vld [vmem:[#allocation9 + $0x54] sm:$0xf]  ;;  %v965_v53 = vld [vmem:[#allocation9 + $0x58] sm:$0xf0] }
 0x188   : > { %668 = vmatpush.bf16.msra.mxu1 %v984_v45  ;;  %v964_v54 = vor.u32 %v1019_v51, %v963_v50  ;;  %v968_v55 = vor.u32 %v1018_v52, %v965_v53  ;;  %v955_v56 = vld [vmem:[#allocation9 + $0x40] sm:$0xf]  ;;  %v1017_v57 = vld [vmem:[#allocation9 + $0x44] sm:$0xf0]  ;;  %v1016_v58 = vld [vmem:[#allocation9 + $0x44] sm:$0xf] }
 0x189   : > { %v957_v59 = vld [vmem:[#allocation9 + $0x48] sm:$0xf0]  ;;  %v956_v60 = vor.u32 %v1017_v57, %v955_v56  ;;  %v947_v62 = vld [vmem:[#allocation9 + $0x30] sm:$0xf]  ;;  %v1015_v63 = vld [vmem:[#allocation9 + $0x34] sm:$0xf0] }
 0x18a   : > { %v960_v61 = vor.u32 %v1016_v58, %v957_v59  ;;  %v1014_v0 = vld [vmem:[#allocation9 + $0x34] sm:$0xf]  ;;  %v949_v1 = vld [vmem:[#allocation9 + $0x38] sm:$0xf0]  ;;  %v948_v2 = vor.u32 %v1015_v63, %v947_v62  ;;  %v939_v4 = vld [vmem:[#allocation9 + $0x20] sm:$0xf] }
 0x18b   : > { %656 = vmatpush.bf16.msra.mxu0 %v972_v48  ;;  %v952_v3 = vor.u32 %v1014_v0, %v949_v1  ;;  %v1013_v5 = vld [vmem:[#allocation9 + $0x24] sm:$0xf0]  ;;  %v1012_v6 = vld [vmem:[#allocation9 + $0x24] sm:$0xf]  ;;  %v941_v7 = vld [vmem:[#allocation9 + $0x28] sm:$0xf0] }
 0x18c   : > { %669 = vmatpush.bf16.msra.mxu1 %v976_v49  ;;  %v940_v8 = vor.u32 %v1013_v5, %v939_v4  ;;  %v944_v9 = vor.u32 %v1012_v6, %v941_v7  ;;  %v931_v10 = vld [vmem:[#allocation9 + $0x10] sm:$0xf]  ;;  %v1011_v11 = vld [vmem:[#allocation9 + $0x14] sm:$0xf0]  ;;  %v1010_v12 = vld [vmem:[#allocation9 + $0x14] sm:$0xf] }
 0x18d   : > { %v933_v13 = vld [vmem:[#allocation9 + $0x18] sm:$0xf0]  ;;  %v932_v14 = vor.u32 %v1011_v11, %v931_v10  ;;  %v923_v16 = vld [vmem:[#allocation9] sm:$0xf]  ;;  %v1009_v17 = vld [vmem:[#allocation9 + $0x4] sm:$0xf0] }
 0x18e   : > { %v936_v15 = vor.u32 %v1010_v12, %v933_v13  ;;  %v1008_v18 = vld [vmem:[#allocation9 + $0x4] sm:$0xf]  ;;  %v925_v19 = vld [vmem:[#allocation9 + $0x8] sm:$0xf0]  ;;  %v924_v20 = vor.u32 %v1009_v17, %v923_v16  ;;  %v554_v22 = vld [vmem:[#allocation3] sm:$0xf] }
 0x18f   : > { %657 = vmatpush.bf16.msra.mxu0 %v964_v54  ;;  %v928_v21 = vor.u32 %v1008_v18, %v925_v19 }
 0x190   : > { %670 = vmatpush.bf16.msra.mxu1 %v968_v55 }
 0x193   : > { %658 = vmatpush.bf16.msra.mxu0 %v956_v60 }
 0x194   : > { %671 = vmatpush.bf16.msra.mxu1 %v960_v61 }
 0x197   : > { %659 = vmatpush.bf16.msra.mxu0 %v948_v2 }
 0x198   : > { %672 = vmatpush.bf16.msra.mxu1 %v952_v3 }
 0x19b   : > { %660 = vmatpush.bf16.msra.mxu0 %v940_v8 }
 0x19c   : > { %673 = vmatpush.bf16.msra.mxu1 %v944_v9 }
 0x19f   : > { %661 = vmatpush.bf16.msra.mxu0 %v932_v14 }
 0x1a0   : > { %674 = vmatpush.bf16.msra.mxu1 %v936_v15 }
 0x1a3   : > { %662 = vmatpush.bf16.msra.mxu0 %v924_v20 }
 0x1a4   : > { %675 = vmatpush.bf16.msra.mxu1 %v928_v21 }
 0x1a6   : > { %663 = vmatmul.bf16.vlgmr.msra.gmra.mxu0 %v554_v22 }
 0x1a7   : > { %676 = vmatmul.bf16.vlgmr.msra.gmra.mxu1 %v554_v22 }
 0x223   : > { %v664_v23 = vpop.f32.mrf.mxu0 }
 0x224   : > { %v677_v24 = vpop.f32.mrf.mxu1 }
 0x225   : > { %v681_v25 = vpack.c.bf16 %v677_v24, %v664_v23 }
 0x227   : > { %682 = vst [vmem:[%s1603_s2] sm:$0xff] %v681_v25 }
 0x22b   : > { %v666_v26 = vpop.f32.mrf.mxu0 }
 0x22c   : > { %v679_v27 = vpop.f32.mrf.mxu1 }
 0x22d PF: > { %s1024_s3 = sshll.u32 %s1393_s22, 3  ;;  %s700_s29 = sshll.u32 %s1603_s2, 4  ;;  %s701_s29 = int_to_ptr.vmem [resolvable:$true] %s700_s29 }
 0x22e   : > { %s698_s6 = scalar_lea.hbm %s1663_s5, %s1024_s3  ;;  %s684_s8 = scalar_lea.sflag [#allocation6], %s1583_s9 }
 0x22f   : > { %s702_s30 = sshll.u32 %s698_s6, 4  ;;  %s1319_s22 = scalar_lea.hbm %s1663_s5, 16  ;;  %s703_s30 = int_to_ptr.hbm [resolvable:$true] %s702_s30 }
 0x230   : > { %s1313_s14 = sshra.s32 %s703_s30, 4  ;;  %s1314_s14 = int_to_ptr.hbm [resolvable:$true] %s1313_s14 }
 0x231   : > { %s1315_s28 = scalar_lea.hbm %s1314_s14, 8  ;;  %p1320_p12 = scmp.lt.s32.totalorder %s1314_s14, %s1663_s5 }
 0x232   : > { %p1316_p9 = scmp.ne.s32.totalorder %s1314_s14, %s1315_s28  ;;  %p1321_p0 = scmp.lt.s32.totalorder %s1319_s22, %s1315_s28 }
 0x234   : > { %p1317_p10 = pnand %p1316_p9, %p1552_p13  ;;  %p1322_p2 = por %p1321_p0, %p1320_p12 }
 0x236   : > { %p1318_p11 = pneg %p1317_p10 }
 0x238   : > { %p1323_p4 = pnand %p1322_p2, %p1318_p11 }
 0x23a   : > { %1326 = shalt.err (!%p1323_p4)
}
 0x23b   : > { %1043 = dma.vmem_to_hbm [thread:$0]  (%p1552_p13), %s701_s29, 128, %s703_s30, %s684_s8  }
 0x23c PF: > { %p1075_p6 = scmp.ge.s32.totalorder %s1405_s25, 2  ;;  %s714_s9 = sand.u32 1, %s1377_s18  }
 0x23d   : > { %s715_s1 = scalar_lea.sflag [#allocation6], %s714_s9 }
 0x23e   : > { %p1063_p7 = pnand %p1075_p6, %p1565_p5 }
 0x240   : > { %p1064_p3 = pneg %p1063_p7 }
 0x242   : > { %1372 = dma.done.wait (%p1064_p3), %s715_s1, 128  }
 0x243   : > { %1374 = vsyncadd (%p1064_p3), %s715_s1, 4294967168  ;;  %s23_s25 = sadd.s32 1, %s1405_s25   ;;  %s1677_s18 = smov %s1381_s19 }
 0x244   : > { %p20_p8 = scmp.ge.s32.totalorder %s23_s25, 6   ;;  %s1678_s19 = smov %s1385_s20 }
 0x245   : > { %s1679_s20 = smov %s1572_s13  ;;  %s1680_s21 = smov %s1397_s23 }
 0x246   : > { %s1681_s22 = smov %s1401_s24  ;;  %s1682_s23 = smov %s1685_s16 }
 0x247   : > { %s1683_s24 = smov %s1689_s17  ;;  %22 = sbr.rel (!%p20_p8) target bundleno = 13 (0xd), region = 119 }
 0x24c   :  { %721 = vsyncpa [#allocation5], 1 }
 0x24d   :  { %723 = vsyncpa [#allocation5 + $0x1], 1 }
 0x24e   :  { %724 = vsyncpa [#allocation8], 1 }
 0x24f   :  { %725 = vsyncpa [#allocation11], 1 }
 0x250   :  { %726 = vsyncpa [#allocation6], 1 }
 0x251   :  { %728 = vsyncpa [#allocation6 + $0x1], 1 }

// kernel: tpu_custom_call.1
= control target key start
LH: loop header
LB: loop body
LE: loop exit
PB: predicated region body
PF: predicated region fallthrough
CT: control target
= control target key end

     0   :  { %s1658_s0 = inlined_call_operand.hbm [shape: f32[2,8,256], index: 0, kind: input, shape index: {}]   ;;  %s1659_s1 = inlined_call_operand.hbm [shape: bf16[256,128], index: 1, kind: input, shape index: {}]   ;;  %s1660_s2 = inlined_call_operand.hbm [shape: bf16[128,256], index: 2, kind: input, shape index: {}]   ;;  %s1661_s3 = inlined_call_operand.hbm [shape: bf16[8,8], index: 3, kind: input, shape index: {}]   ;;  %s1662_s4 = inlined_call_operand.hbm [shape: f32[8,128], index: 4, kind: input, shape index: {}]   ;;  %s1663_s5 = inlined_call_operand.hbm [shape: bf16[2,8,256], index: 5, kind: output, shape index: {}]  }
   0x1   :  { %1664 = sst [smem:[#allocation18_spill]] %s1659_s1 }
   0x2   :  { %1665 = sst [smem:[#allocation19_spill]] %s1660_s2 }
   0x3   :  { %1666 = sst [smem:[#allocation20_spill]] %s1661_s3 }
   0x4   :  { %10 = vsyncpa [#allocation5], 0 }
   0x5   :  { %12 = vsyncpa [#allocation5 + $0x1], 0 }
   0x6   :  { %13 = vsyncpa [#allocation8], 0 }
   0x7   :  { %14 = vsyncpa [#allocation11], 0 }
   0x8   :  { %15 = vsyncpa [#allocation6], 0 }
   0x9   :  { %17 = vsyncpa [#allocation6 + $0x1], 0  ;;  %s1446_s18 = smov 0   ;;  %s1448_s19 = smov 0  }
   0xa   :  { %s1450_s20 = smov 0   ;;  %s1452_s21 = smov 0  }
   0xb   :  { %s1454_s22 = smov 0   ;;  %s1456_s23 = smov 0  }
   0xc   :  { %s1458_s24 = smov 0   ;;  %s1460_s25 = smov 0  }
   0xd LB: > { %s835_s26 = sadd.s32 4294967295, %s1405_s25   ;;  %p837_p0 = scmp.ge.s32.totalorder %s1405_s25, 1  ;;  %s1405_s25 = sphi %s1460_s25, %s23_s25   ;;  %s1401_s24 = sphi %s1458_s24, %s1683_s24   ;;  %s1397_s23 = sphi %s1456_s23, %s1682_s23   ;;  %s1393_s22 = sphi %s1454_s22, %s1681_s22   ;;  %s1389_s21 = sphi %s1452_s21, %s1680_s21   ;;  %s1385_s20 = sphi %s1450_s20, %s1679_s20   ;;  %s1381_s19 = sphi %s1448_s19, %s1678_s19   ;;  %s1377_s18 = sphi %s1446_s18, %s1677_s18  }
   0xe   : > { %p1490_p1 = scmp.eq.s32.totalorder %s835_s26, 0  ;;  %p193_p2 = scmp.lt.s32.totalorder %s1405_s25, 5 }
   0xf   : > { %s1668_s1 = sld [smem:[#allocation18_spill]]  ;;  %s1407_s7 = smov [#allocation7]  }
  0x10   : > { %p1498_p3 = pnand %p837_p0, %p193_p2  ;;  %s206_s8 = sshll.u32 %s1407_s7, 4  ;;  %s207_s8 = int_to_ptr.vmem [resolvable:$true] %s206_s8 }
  0x11   : > { %s1671_s3 = sld [smem:[#allocation20_spill]]  ;;  %s1408_s13 = smov 64  }
  0x12   : > { %p1045_p4 = pneg %p1498_p3  ;;  %s1409_s14 = smov 4  }
  0x13   : > { %s1410_s15 = smov [#allocation10]   ;;  %s1672_s2 = sld [smem:[#allocation19_spill]] }
  0x14   : > { %p1506_p5 = pnand %p1045_p4, %p1490_p1  ;;  %s235_s16 = sshll.u32 %s1410_s15, 4  ;;  %s236_s16 = int_to_ptr.vmem [resolvable:$true] %s235_s16 }
  0x15   : > { %s204_s30 = sshll.u32 %s1668_s1, 4  ;;  %s1411_s7 = smov [#allocation9]   ;;  %s205_s30 = int_to_ptr.hbm [resolvable:$true] %s204_s30 }
  0x16   : > { %1048 = dma.hbm_to_vmem [thread:$0]  (!%p1506_p5), %s205_s30, 2048, %s207_s8, [#allocation8], %s1408_s13, %s1408_s13, %s1409_s14  }
  0x17   : > { %s233_s12 = sshll.u32 %s1671_s3, 4  ;;  %s220_s10 = sshll.u32 %s1411_s7, 4  ;;  %s234_s12 = int_to_ptr.hbm [resolvable:$true] %s233_s12  ;;  %s221_s10 = int_to_ptr.vmem [resolvable:$true] %s220_s10 }
  0x18   : > { %1054 = dma.hbm_to_vmem [thread:$0]  (!%p1506_p5), %s234_s12, 64, %s236_s16, [#allocation11]  }
  0x19   : > { %s218_s29 = sshll.u32 %s1672_s2, 4  ;;  %s245_s11 = sshll.u32 %s1662_s4, 4  ;;  %s219_s29 = int_to_ptr.hbm [resolvable:$true] %s218_s29  ;;  %s246_s11 = int_to_ptr.hbm [resolvable:$true] %s245_s11 }
  0x1a   : > { %s1412_s13 = smov 128   ;;  %s1413_s14 = smov 8  }
  0x1b   : > { %1051 = dma.hbm_to_vmem [thread:$0]  (!%p1506_p5), %s219_s29, 2048, %s221_s10, [#allocation8], %s1412_s13, %s1412_s13, %s1413_s14  }
  0x1c   : > { %s1414_s12 = smov [#allocation12]   ;;  %s38_s16 = sadd.s32 1, %s1397_s23 }
  0x1d   : > { %s247_s15 = sshll.u32 %s1414_s12, 4  ;;  %p40_p6 = scmp.ge.s32.totalorder %s38_s16, 2  ;;  %s248_s15 = int_to_ptr.vmem [resolvable:$true] %s247_s15 }
  0x1e   : > { %1057 = dma.hbm_to_vmem [thread:$0]  (!%p1506_p5), %s246_s11, 128, %s248_s15, [#allocation11]  }
  0x1f   : > { %s42_s17 = sadd.s32 1, %s1401_s24  ;;  %s836_s28 = sadd.s32 4294967294, %s1405_s25  }
  0x20   : > { %p62_p7 = scmp.ne.s32.totalorder %s1385_s20, %s1381_s19  ;;  %s1685_s16 = smov (%p40_p6, %s38_s16), 0 }
  0x21   : > { %s1687_s17 = smov (!%p40_p6, %s42_s17), %s1401_s24  ;;  %p63_p8 = scmp.eq.s32.totalorder %s1405_s25, 0 }
  0x22   : > { %p68_p9 = scmp.ne.s32.totalorder %s1381_s19, %s1377_s18  ;;  %p44_p10 = scmp.ge.s32.totalorder %s1687_s17, 2 }
  0x23   : > { %p180_p11 = scmp.eq.s32.totalorder %s835_s26, 3  ;;  %s55_s9 = sadd.s32 1, %s1385_s20 }
  0x24   : > { %p1543_p12 = por %p1490_p1, %p68_p9  ;;  %s1689_s17 = smov (%p44_p10, %s1687_s17), 0 }
  0x25   : > { %p1552_p13 = por %p180_p11, %p62_p7  ;;  %p186_p0 = scmp.eq.s32.totalorder %s836_s28, 3 }
  0x26   : > { %s50_s10 = ssub.s32 %s1401_s24, %s1689_s17  ;;  %p1561_p2 = por %p63_p8, %p62_p7 }
  0x27   : > { %p53_p4 = scmp.eq.s32.totalorder %s50_s10, 0  ;;  %p1565_p5 = por %p186_p0, %p68_p9 }
  0x28   : > { %s258_s8 = sand.u32 1, %s1385_s20   ;;  %s990_s11 = sshll.u32 %s1401_s24, 4 }
  0x29   : > { %s1572_s13 = scalar_select %p53_p4, %s1385_s20, %s55_s9  }
  0x2a   : > { %p1070_p6 = scmp.lt.s32.totalorder %s1405_s25, 4  ;;  %s843_s14 = sshll.u32 %s258_s8, 4 }
  0x2b   : > { %s271_s28 = scalar_lea.hbm %s1658_s0, %s990_s11  ;;  %s262_s2 = scalar_lea.vmem [#allocation4], %s843_s14 }
  0x2c   : > { %s273_s1 = sshll.u32 %s271_s28, 4  ;;  %s275_s3 = sshll.u32 %s262_s2, 4  ;;  %s274_s1 = int_to_ptr.hbm [resolvable:$true] %s273_s1  ;;  %s276_s3 = int_to_ptr.vmem [resolvable:$true] %s275_s3 }
  0x2d   : > { %p1059_p7 = pnand %p1070_p6, %p1561_p2  ;;  %s259_s10 = scalar_lea.sflag [#allocation5], %s258_s8 }
  0x2e   : > { %284 = sbr.rel (%p1498_p3) target bundleno = 572 (0x23c), region = 40  ;;  %s1583_s9 = sand.u32 (!%p1498_p3), 1, %s1381_s19  }
  0x2f   : > { %1061 = dma.hbm_to_vmem [thread:$0]  (!%p1059_p7), %s274_s1, 256, %s276_s3, %s259_s10  }
  0x30   : > { %s847_s12 = sshll.u32 (!%p1498_p3), %s1583_s9, 4  ;;  %s287_s11 = scalar_lea.sflag (!%p1498_p3), [#allocation5], %s1583_s9 }
  0x31   : > { %s1587_s15 = scalar_lea.vmem (!%p1498_p3), [#allocation4], %s847_s12 }
  0x33   : > { %1360 = dma.done.wait (%p1543_p12), %s287_s11, 256  }
  0x34   : > { %1362 = vsyncadd (%p1543_p12), %s287_s11, 4294967040 }
  0x35   : > { %1364 = dma.done.wait (%p1490_p1), [#allocation8], 4096  }
  0x36   : > { %1366 = vsyncadd (%p1490_p1), [#allocation8], 4294963200 }
  0x37   : > { %1368 = dma.done.wait (%p1490_p1), [#allocation11], 192  }
  0x38   : > { %1370 = vsyncadd (%p1490_p1), [#allocation11], 4294967104  ;;  %s852_s1 = sshll.u32 %s1583_s9, 3  ;;  %p345_p3 = scmp.eq.s32.totalorder %s1389_s21, 0 }
  0x39   : > { %s1603_s2 = scalar_lea.vmem [#allocation13], %s852_s1  ;;  %v1415_v0 = vmov (%p345_p3), 0.0  }
  0x3a   : > { %350 = sbr.rel (!%p345_p3) target bundleno = 63 (0x3f), region = 64  ;;  %351 = vst [vmem:[#allocation2] sm:$0xff] (%p345_p3), %v1415_v0 }
  0x3f PF: > { %p854_p8 = scmp.ne.s32.totalorder %s1389_s21, 0 }
  0x41   : > { %354 = sbr.rel (%p854_p8) target bundleno = 237 (0xed), region = 68 }
  0x46   : > { %v999_v1 = vld [vmem:[#allocation7 + $0x38] sm:$0xff]  ;;  %v998_v3 = vld [vmem:[#allocation7 + $0x30] sm:$0xff]  ;;  %v997_v5 = vld [vmem:[#allocation7 + $0x28] sm:$0xff] }
  0x47   : > { %v1007_v2 = vld [vmem:[#allocation7 + $0x78] sm:$0xff]  ;;  %492 = vmatpush.bf16.msra.mxu0 %v999_v1  ;;  %v1006_v4 = vld [vmem:[#allocation7 + $0x70] sm:$0xff]  ;;  %v1005_v6 = vld [vmem:[#allocation7 + $0x68] sm:$0xff] }
  0x48   : > { %505 = vmatpush.bf16.msra.mxu1 %v1007_v2  ;;  %v996_v7 = vld [vmem:[#allocation7 + $0x20] sm:$0xff]  ;;  %v995_v9 = vld [vmem:[#allocation7 + $0x18] sm:$0xff]  ;;  %v994_v11 = vld [vmem:[#allocation7 + $0x10] sm:$0xff] }
  0x49   : > { %v1004_v8 = vld [vmem:[#allocation7 + $0x60] sm:$0xff]  ;;  %v1003_v10 = vld [vmem:[#allocation7 + $0x58] sm:$0xff]  ;;  %v1002_v12 = vld [vmem:[#allocation7 + $0x50] sm:$0xff] }
  0x4a   : > { %v993_v13 = vld [vmem:[#allocation7 + $0x8] sm:$0xff]  ;;  %v992_v15 = vld [vmem:[#allocation7] sm:$0xff]  ;;  %v355_v22 = vld [vmem:[#allocation2] sm:$0xff] }
  0x4b   : > { %493 = vmatpush.bf16.msra.mxu0 %v998_v3  ;;  %v1001_v14 = vld [vmem:[#allocation7 + $0x48] sm:$0xff]  ;;  %v1000_v16 = vld [vmem:[#allocation7 + $0x40] sm:$0xff] }
  0x4c   : > { %506 = vmatpush.bf16.msra.mxu1 %v1006_v4  ;;  %v356_v17 = vld [vmem:[%s1587_s15] sm:$0xff]  ;;  %v357_v18 = vld [vmem:[%s1587_s15 + $0x8] sm:$0xff] }
  0x4d   : > { %v358_v19 = vpack.c.bf16 %v356_v17, %v356_v17  ;;  %v359_v20 = vpack.c.bf16 %v357_v18, %v357_v18 }
  0x4f   : > { %494 = vmatpush.bf16.msra.mxu0 %v997_v5 }
  0x50   : > { %507 = vmatpush.bf16.msra.mxu1 %v1005_v6 }
  0x53   : > { %495 = vmatpush.bf16.msra.mxu0 %v996_v7 }
  0x54   : > { %508 = vmatpush.bf16.msra.mxu1 %v1004_v8 }
  0x57   : > { %496 = vmatpush.bf16.msra.mxu0 %v995_v9 }
  0x58   : > { %509 = vmatpush.bf16.msra.mxu1 %v1003_v10 }
  0x5b   : > { %497 = vmatpush.bf16.msra.mxu0 %v994_v11 }
  0x5c   : > { %510 = vmatpush.bf16.msra.mxu1 %v1002_v12 }
  0x5f   : > { %498 = vmatpush.bf16.msra.mxu0 %v993_v13 }
  0x60   : > { %511 = vmatpush.bf16.msra.mxu1 %v1001_v14 }
  0x63   : > { %499 = vmatpush.bf16.msra.mxu0 %v992_v15 }
  0x64   : > { %512 = vmatpush.bf16.msra.mxu1 %v1000_v16 }
  0x66   : > { %500 = vmatmul.bf16.vlgmr.msra.gmra.mxu0 %v358_v19 }
  0x67   : > { %513 = vmatmul.bf16.vlgmr.msra.gmra.mxu1 %v359_v20 }
  0xe3   : > { %v501_v21 = vpop.f32.mrf.mxu0 }
  0xe4   : > { %v514_v23 = vpop.f32.mrf.mxu1 }
  0xe5   : > { %v515_v24 = vadd.f32 %v514_v23, %v501_v21 }
  0xe7   : > { %v518_v25 = vadd.f32 %v515_v24, %v355_v22 }
  0xe9   : > { %519 = vst [vmem:[#allocation2] sm:$0xff] %v518_v25 }
  0xeb   : > { %v503_v26 = vpop.f32.mrf.mxu0 }
  0xec   : > { %v516_v27 = vpop.f32.mrf.mxu1 }
  0xed PF: > { %521 = sbr.rel (!%p345_p3) target bundleno = 381 (0x17d), region = 72  ;;  %vm530_vm0 = vcmask (%p345_p3), 1043456   ;;  %v522_v31 = vld [vmem:[#allocation10] sm:$0xf] (%p345_p3)  ;;  %vm526_vm1 = vcmask (%p345_p3), 64512   ;;  %v525_v32 = vld [vmem:[#allocation12] sm:$0xff] (%p345_p3) }
  0xf0   : > { %v523_v28 = vld [vmem:[#allocation2] sm:$0xff] (%p345_p3) }
  0xf1   : > { %v524_v29 = vpack.c.bf16 (%p345_p3), %v523_v28, %v523_v28 }
  0xf3   : > { %v532_v30 = vsel %vm530_vm0, %v524_v29, 0 }
  0xf4   : > { %541 = vmatpush.bf16.msra.mxu0 %v532_v30 }
  0xf7   : > { %919 = vmatmul.msk.bf16.vlgmr.msra.gmra.mxu0 %vm526_vm1, %v522_v31 }
 0x174   : > { %v543_v33 = vpop.f32.mrf.mxu0 }
 0x175   : > { %v544_v34 = vadd.f32 %v543_v33, %v525_v32 }
 0x177   : > { %v547_v35 = vmax.f32 %v544_v34, 0.0 }
 0x179   : > { %v548_v36 = vpack.c.bf16 %v547_v35, %v547_v35 }
 0x17b   : > { %549 = vst [vmem:[#allocation3] sm:$0xf] %v548_v36 }
 0x17c   : > { %v545_v37 = vpop.f32.mrf.mxu0 }
 0x17d PF: > { %p920_p1 = scmp.ne.s32.totalorder %s1389_s21, 1 }
 0x17f   : > { %553 = sbr.rel (%p920_p1) target bundleno = 557 (0x22d), region = 76 }
 0x184   : > { %v979_v38 = vld [vmem:[#allocation9 + $0x70] sm:$0xf]  ;;  %v1023_v39 = vld [vmem:[#allocation9 + $0x74] sm:$0xf0]  ;;  %v1022_v40 = vld [vmem:[#allocation9 + $0x74] sm:$0xf] }
 0x185   : > { %v980_v41 = vor.u32 %v1023_v39, %v979_v38  ;;  %v981_v42 = vld [vmem:[#allocation9 + $0x78] sm:$0xf0]  ;;  %v971_v43 = vld [vmem:[#allocation9 + $0x60] sm:$0xf]  ;;  %v1021_v44 = vld [vmem:[#allocation9 + $0x64] sm:$0xf0] }
 0x186   : > { %v984_v45 = vor.u32 %v1022_v40, %v981_v42  ;;  %v1020_v46 = vld [vmem:[#allocation9 + $0x64] sm:$0xf]  ;;  %v973_v47 = vld [vmem:[#allocation9 + $0x68] sm:$0xf0]  ;;  %v972_v48 = vor.u32 %v1021_v44, %v971_v43  ;;  %v963_v50 = vld [vmem:[#allocation9 + $0x50] sm:$0xf] }
 0x187   : > { %655 = vmatpush.bf16.msra.mxu0 %v980_v41  ;;  %v976_v49 = vor.u32 %v1020_v46, %v973_v47  ;;  %v1019_v51 = vld [vmem:[#allocation9 + $0x54] sm:$0xf0]  ;;  %v1018_v52 = vld [vmem:[#allocation9 + $0x54] sm:$0xf]  ;;  %v965_v53 = vld [vmem:[#allocation9 + $0x58] sm:$0xf0] }
 0x188   : > { %668 = vmatpush.bf16.msra.mxu1 %v984_v45  ;;  %v964_v54 = vor.u32 %v1019_v51, %v963_v50  ;;  %v968_v55 = vor.u32 %v1018_v52, %v965_v53  ;;  %v955_v56 = vld [vmem:[#allocation9 + $0x40] sm:$0xf]  ;;  %v1017_v57 = vld [vmem:[#allocation9 + $0x44] sm:$0xf0]  ;;  %v1016_v58 = vld [vmem:[#allocation9 + $0x44] sm:$0xf] }
 0x189   : > { %v957_v59 = vld [vmem:[#allocation9 + $0x48] sm:$0xf0]  ;;  %v956_v60 = vor.u32 %v1017_v57, %v955_v56  ;;  %v947_v62 = vld [vmem:[#allocation9 + $0x30] sm:$0xf]  ;;  %v1015_v63 = vld [vmem:[#allocation9 + $0x34] sm:$0xf0] }
 0x18a   : > { %v960_v61 = vor.u32 %v1016_v58, %v957_v59  ;;  %v1014_v0 = vld [vmem:[#allocation9 + $0x34] sm:$0xf]  ;;  %v949_v1 = vld [vmem:[#allocation9 + $0x38] sm:$0xf0]  ;;  %v948_v2 = vor.u32 %v1015_v63, %v947_v62  ;;  %v939_v4 = vld [vmem:[#allocation9 + $0x20] sm:$0xf] }
 0x18b   : > { %656 = vmatpush.bf16.msra.mxu0 %v972_v48  ;;  %v952_v3 = vor.u32 %v1014_v0, %v949_v1  ;;  %v1013_v5 = vld [vmem:[#allocation9 + $0x24] sm:$0xf0]  ;;  %v1012_v6 = vld [vmem:[#allocation9 + $0x24] sm:$0xf]  ;;  %v941_v7 = vld [vmem:[#allocation9 + $0x28] sm:$0xf0] }
 0x18c   : > { %669 = vmatpush.bf16.msra.mxu1 %v976_v49  ;;  %v940_v8 = vor.u32 %v1013_v5, %v939_v4  ;;  %v944_v9 = vor.u32 %v1012_v6, %v941_v7  ;;  %v931_v10 = vld [vmem:[#allocation9 + $0x10] sm:$0xf]  ;;  %v1011_v11 = vld [vmem:[#allocation9 + $0x14] sm:$0xf0]  ;;  %v1010_v12 = vld [vmem:[#allocation9 + $0x14] sm:$0xf] }
 0x18d   : > { %v933_v13 = vld [vmem:[#allocation9 + $0x18] sm:$0xf0]  ;;  %v932_v14 = vor.u32 %v1011_v11, %v931_v10  ;;  %v923_v16 = vld [vmem:[#allocation9] sm:$0xf]  ;;  %v1009_v17 = vld [vmem:[#allocation9 + $0x4] sm:$0xf0] }
 0x18e   : > { %v936_v15 = vor.u32 %v1010_v12, %v933_v13  ;;  %v1008_v18 = vld [vmem:[#allocation9 + $0x4] sm:$0xf]  ;;  %v925_v19 = vld [vmem:[#allocation9 + $0x8] sm:$0xf0]  ;;  %v924_v20 = vor.u32 %v1009_v17, %v923_v16  ;;  %v554_v22 = vld [vmem:[#allocation3] sm:$0xf] }
 0x18f   : > { %657 = vmatpush.bf16.msra.mxu0 %v964_v54  ;;  %v928_v21 = vor.u32 %v1008_v18, %v925_v19 }
 0x190   : > { %670 = vmatpush.bf16.msra.mxu1 %v968_v55 }
 0x193   : > { %658 = vmatpush.bf16.msra.mxu0 %v956_v60 }
 0x194   : > { %671 = vmatpush.bf16.msra.mxu1 %v960_v61 }
 0x197   : > { %659 = vmatpush.bf16.msra.mxu0 %v948_v2 }
 0x198   : > { %672 = vmatpush.bf16.msra.mxu1 %v952_v3 }
 0x19b   : > { %660 = vmatpush.bf16.msra.mxu0 %v940_v8 }
 0x19c   : > { %673 = vmatpush.bf16.msra.mxu1 %v944_v9 }
 0x19f   : > { %661 = vmatpush.bf16.msra.mxu0 %v932_v14 }
 0x1a0   : > { %674 = vmatpush.bf16.msra.mxu1 %v936_v15 }
 0x1a3   : > { %662 = vmatpush.bf16.msra.mxu0 %v924_v20 }
 0x1a4   : > { %675 = vmatpush.bf16.msra.mxu1 %v928_v21 }
 0x1a6   : > { %663 = vmatmul.bf16.vlgmr.msra.gmra.mxu0 %v554_v22 }
 0x1a7   : > { %676 = vmatmul.bf16.vlgmr.msra.gmra.mxu1 %v554_v22 }
 0x223   : > { %v664_v23 = vpop.f32.mrf.mxu0 }
 0x224   : > { %v677_v24 = vpop.f32.mrf.mxu1 }
 0x225   : > { %v681_v25 = vpack.c.bf16 %v677_v24, %v664_v23 }
 0x227   : > { %682 = vst [vmem:[%s1603_s2] sm:$0xff] %v681_v25 }
 0x22b   : > { %v666_v26 = vpop.f32.mrf.mxu0 }
 0x22c   : > { %v679_v27 = vpop.f32.mrf.mxu1 }
 0x22d PF: > { %s1024_s3 = sshll.u32 %s1393_s22, 3  ;;  %s700_s29 = sshll.u32 %s1603_s2, 4  ;;  %s701_s29 = int_to_ptr.vmem [resolvable:$true] %s700_s29 }
 0x22e   : > { %s698_s6 = scalar_lea.hbm %s1663_s5, %s1024_s3  ;;  %s684_s8 = scalar_lea.sflag [#allocation6], %s1583_s9 }
 0x22f   : > { %s702_s30 = sshll.u32 %s698_s6, 4  ;;  %s1319_s22 = scalar_lea.hbm %s1663_s5, 16  ;;  %s703_s30 = int_to_ptr.hbm [resolvable:$true] %s702_s30 }
 0x230   : > { %s1313_s14 = sshra.s32 %s703_s30, 4  ;;  %s1314_s14 = int_to_ptr.hbm [resolvable:$true] %s1313_s14 }
 0x231   : > { %s1315_s28 = scalar_lea.hbm %s1314_s14, 8  ;;  %p1320_p12 = scmp.lt.s32.totalorder %s1314_s14, %s1663_s5 }
 0x232   : > { %p1316_p9 = scmp.ne.s32.totalorder %s1314_s14, %s1315_s28  ;;  %p1321_p0 = scmp.lt.s32.totalorder %s1319_s22, %s1315_s28 }
 0x234   : > { %p1317_p10 = pnand %p1316_p9, %p1552_p13  ;;  %p1322_p2 = por %p1321_p0, %p1320_p12 }
 0x236   : > { %p1318_p11 = pneg %p1317_p10 }
 0x238   : > { %p1323_p4 = pnand %p1322_p2, %p1318_p11 }
 0x23a   : > { %1326 = shalt.err (!%p1323_p4)
}
 0x23b   : > { %1043 = dma.vmem_to_hbm [thread:$0]  (%p1552_p13), %s701_s29, 128, %s703_s30, %s684_s8  }
 0x23c PF: > { %p1075_p6 = scmp.ge.s32.totalorder %s1405_s25, 2  ;;  %s714_s9 = sand.u32 1, %s1377_s18  }
 0x23d   : > { %s715_s1 = scalar_lea.sflag [#allocation6], %s714_s9 }
 0x23e   : > { %p1063_p7 = pnand %p1075_p6, %p1565_p5 }
 0x240   : > { %p1064_p3 = pneg %p1063_p7 }
 0x242   : > { %1372 = dma.done.wait (%p1064_p3), %s715_s1, 128  }
 0x243   : > { %1374 = vsyncadd (%p1064_p3), %s715_s1, 4294967168  ;;  %s23_s25 = sadd.s32 1, %s1405_s25   ;;  %s1677_s18 = smov %s1381_s19 }
 0x244   : > { %p20_p8 = scmp.ge.s32.totalorder %s23_s25, 6   ;;  %s1678_s19 = smov %s1385_s20 }
 0x245   : > { %s1679_s20 = smov %s1572_s13  ;;  %s1680_s21 = smov %s1397_s23 }
 0x246   : > { %s1681_s22 = smov %s1401_s24  ;;  %s1682_s23 = smov %s1685_s16 }
 0x247   : > { %s1683_s24 = smov %s1689_s17  ;;  %22 = sbr.rel (!%p20_p8) target bundleno = 13 (0xd), region = 119 }
 0x24c   :  { %721 = vsyncpa [#allocation5], 1 }
 0x24d   :  { %723 = vsyncpa [#allocation5 + $0x1], 1 }
 0x24e   :  { %724 = vsyncpa [#allocation8], 1 }
 0x24f   :  { %725 = vsyncpa [#allocation11], 1 }
 0x250   :  { %726 = vsyncpa [#allocation6], 1 }
 0x251   :  { %728 = vsyncpa [#allocation6 + $0x1], 1 }

</bundles_post_ra>
